<compile_context>
chip_gen: v7x
topology: tpu7x:2x2x1
jax: 0.10.0
libtpu: 0.0.40
codegen_flags: <defaults>
</compile_context>

<pallas_src>
import functools
import math

import jax
import jax.numpy as jnp
from jax import lax
from jax.experimental import pallas as pl
from jax.experimental.pallas import tpu as pltpu


def _round_up(x, n):
    return (x + n - 1) // n * n


def _detect_vmem_cap_bytes():
    """Physical VMEM capacity minus headroom; falls back to a v7x-safe value."""
    try:
        cap = int(pltpu.get_tpu_info().vmem_capacity_bytes)
        if cap <= 0:
            raise ValueError
    except Exception:
        cap = 64 << 20            # conservative (v7x) default
    return max(cap - (16 << 20), 32 << 20)


def _select_tiles(C, D, cos_bytes, vmem_cap):
    """Pick (TB cap, TC) at init (C and D are both known at init)."""
    big = vmem_cap >= (96 << 20)          # 128-MiB-VMEM parts (v5e / v6e)
    tb_cap = 1024 if big else 512
    tc_cap = 4096 if big else 2048
    tc = min(tc_cap, _round_up(max(C, 1), 128))

    def wset(tb, tcc):
        # double-buffered x + W + cos (+ labels) tiles + slack
        return 2 * (tb * D * 2 + tcc * D * 2 + tb * tcc * cos_bytes + tb * 4) + (2 << 20)

    while tc > 128 and wset(tb_cap, tc) > vmem_cap:
        tc = max(128, _round_up(tc // 2, 128))
    while tb_cap > 8 and wset(tb_cap, tc) > vmem_cap:
        tb_cap = max(8, tb_cap // 2)
    return tb_cap, tc


# -----------------------------------------------------------------------------
# Kernel 1: row-wise L2 normalization of the class prototypes
#           (F.normalize(weight, dim=1, eps=1e-5)); run once per weight, cached.
#           Emitted bf16 so the big weight stream into the main kernel is half
#           the HBM bytes.
# TODO(synk): on v7x an fp8 (e4m3) output would halve the weight stream again;
#             left as an opt-in since it needs accuracy validation.
# -----------------------------------------------------------------------------
def _normalize_weight_kernel(w_ref, wn_ref):
    w = w_ref[...]                                          # (TCn, D) f32
    sumsq = jnp.sum(w * w, axis=1, keepdims=True)
    # w / max(||w||, 1e-5)  ==  w * rsqrt(max(||w||^2, 1e-10))
    inv = lax.rsqrt(jnp.maximum(sumsq, 1e-10))
    wn_ref[...] = (w * inv).astype(wn_ref.dtype)


# -----------------------------------------------------------------------------
# Kernel 2a: cos_theta only (no-label / inference path). No loss math at all.
#            NT contraction (contract last dims of both) -> native MXU form.
# -----------------------------------------------------------------------------
def _cos_kernel(x_ref, wn_ref, cos_ref):
    cos_ref[...] = lax.dot_general(
        x_ref[...], wn_ref[...],
        dimension_numbers=(((1,), (1,)), ((), ())),
        preferred_element_type=jnp.float32).astype(cos_ref.dtype)


# -----------------------------------------------------------------------------
# Kernel 2b: cos_theta + loss (training path).
#   grid = (outer, inner), both "parallel"; each step writes its own cos tile
#   and its own (1,1) SMEM loss partial (no resident accumulator -> v7x safe).
# -----------------------------------------------------------------------------
def _uce_kernel(x_ref, wn_ref, label_ref, cos_ref, loss_ref, *,
                s, m, l, bias, tb, tc, n_batch, n_classes,
                mask_rows, mask_cols, class_outer):
    if class_outer:
        c, b = pl.program_id(0), pl.program_id(1)
    else:
        b, c = pl.program_id(0), pl.program_id(1)

    x = x_ref[...]                                          # (TB, D) bf16
    w = wn_ref[...]                                         # (TC, D) bf16
    cos = lax.dot_general(                                  # MXU bf16 x bf16 -> f32
        x, w, dimension_numbers=(((1,), (1,)), ((), ())),
        preferred_element_type=jnp.float32)                 # (TB, TC) f32
    cos_ref[...] = cos.astype(cos_ref.dtype)

    labels = label_ref[...]                                 # (TB, 1) int32
    cls = lax.broadcasted_iota(jnp.int32, (tb, tc), 1) + c * tc
    one_hot = cls == labels                                 # (TB, TC) bool

    # Single softplus per element: select the argument with the one-hot mask
    # BEFORE the exp/log (halves the EUP transcendental work).
    arg_p = bias - s * (cos - m)                            # = -(s*(cos-m) - bias)
    arg_n = s * cos - bias
    arg = jnp.clip(jnp.where(one_hot, arg_p, arg_n), -s, s)
    # log(1+exp) matches the PyTorch reference exactly (same underflow behavior).
    softplus = jnp.log(1.0 + jnp.exp(arg))
    per_elem = softplus if l == 1.0 else jnp.where(one_hot, 1.0, l) * softplus

    # Padding masks only when padding actually exists in that dimension.
    if mask_rows or mask_cols:
        valid = None
        if mask_cols:
            valid = cls < n_classes
        if mask_rows:
            rows = lax.broadcasted_iota(jnp.int32, (tb, 1), 0) + b * tb
            rmask = rows < n_batch
            valid = rmask if valid is None else (valid & rmask)
        per_elem = jnp.where(valid, per_elem, 0.0)

    loss_ref[0, 0] = jnp.sum(per_elem)                      # per-(b,c) partial


# -----------------------------------------------------------------------------
# Module wrapper.
# -----------------------------------------------------------------------------
class UnifiedCrossEntropyLossPallas:
    def __init__(self, in_features, out_features, m=0.4, s=64, l=1.0, r=1.0,
                 key=None, cos_dtype=jnp.bfloat16):
        self.in_features = int(in_features)
        self.out_features = int(out_features)
        self.m = float(m)
        self.s = float(s)
        self.l = float(l)
        self.r = float(r)
        self.cos_dtype = cos_dtype

        if key is None:
            key = jax.random.PRNGKey(0)
        # kaiming_normal_(a=1, mode='fan_in', nonlinearity='leaky_relu'):
        # gain = sqrt(2 / (1 + a^2)) = 1, std = 1 / sqrt(fan_in)
        std = 1.0 / math.sqrt(in_features)
        self.weight = std * jax.random.normal(
            key, (out_features, in_features), dtype=jnp.float32)
        self.bias = jnp.full((1,), math.log(out_features * r * 10), dtype=jnp.float32)
        # bias is a fixed function of (out_features, r) here (forward only),
        # so it is baked into the kernel as a Python constant.
        self._bias_val = float(math.log(out_features * r * 10))

        # ---- static tiling decided once at init (C and D are known) ----
        self._vmem_cap = _detect_vmem_cap_bytes()
        cos_bytes = jnp.dtype(self.cos_dtype).itemsize
        self._tb_cap, self._tc = _select_tiles(
            self.out_features, self.in_features, cos_bytes, self._vmem_cap)
        self._c_pad = _round_up(self.out_features, self._tc)

        # Pre-pad the f32 weight ONCE (no per-forward HBM pad pass).
        if self._c_pad != self.out_features:
            self._weight_padded = jnp.pad(
                self.weight, ((0, self._c_pad - self.out_features), (0, 0)))
        else:
            self._weight_padded = self.weight

        self._wn = None          # cached normalized bf16 weight (weight is frozen)
        self._fn_cache = {}      # jitted per-(B, has_label) forward functions

    # -- kernel 1: normalize the weight once, cache the bf16 result --
    def _normalized_weight(self):
        if self._wn is None:
            C_pad, D = self._weight_padded.shape
            tc_norm = 128
            for cand in (2048, 1024, 512, 256):
                if C_pad % cand == 0 and 2 * cand * D * 6 + (2 << 20) <= self._vmem_cap:
                    tc_norm = cand
                    break
            vmem = 2 * (tc_norm * D * 4 + tc_norm * D * 2) + (2 << 20)
            vmem = int(min(max(vmem, 8 << 20), self._vmem_cap))
            self._wn = pl.pallas_call(
                _normalize_weight_kernel,
                out_shape=jax.ShapeDtypeStruct((C_pad, D), jnp.bfloat16),
                grid=(C_pad // tc_norm,),
                in_specs=[pl.BlockSpec((tc_norm, D), lambda i: (i, 0))],
                out_specs=pl.BlockSpec((tc_norm, D), lambda i: (i, 0)),
                compiler_params=pltpu.CompilerParams(
                    dimension_semantics=("parallel",),
                    vmem_limit_bytes=vmem),
            )(self._weight_padded)
        return self._wn

    # -- build (and jit) the per-batch-size forward --
    def _build_fn(self, B, with_label):
        C, D = self.out_features, self.in_features
        C_pad, TC = self._c_pad, self._tc
        TB = min(self._tb_cap, _round_up(max(B, 1), 8))
        B_pad = _round_up(B, TB)
        nb, nc = B_pad // TB, C_pad // TC

        cos_bytes = jnp.dtype(self.cos_dtype).itemsize
        vmem = 2 * (TB * D * 2 + TC * D * 2 + TB * TC * cos_bytes + TB * 4) + (2 << 20)
        vmem = int(min(max(vmem, 8 << 20), self._vmem_cap))

        if not with_label:
            call = pl.pallas_call(
                _cos_kernel,
                out_shape=jax.ShapeDtypeStruct((B_pad, C_pad), self.cos_dtype),
                grid=(nb, nc),
                in_specs=[pl.BlockSpec((TB, D), lambda b, c: (b, 0)),
                          pl.BlockSpec((TC, D), lambda b, c: (c, 0))],
                out_specs=pl.BlockSpec((TB, TC), lambda b, c: (b, c)),
                compiler_params=pltpu.CompilerParams(
                    dimension_semantics=("parallel", "parallel"),
                    vmem_limit_bytes=vmem))

            def fn(x, wn):
                x_p = x.astype(jnp.bfloat16)
                if B_pad != B:
                    x_p = jnp.pad(x_p, ((0, B_pad - B), (0, 0)))
                cos_pad = call(x_p, wn)
                return cos_pad[:B, :C]
            return jax.jit(fn)

        # Grid order: keep the bigger re-streamed operand streamed only once.
        class_outer = (nb - 1) * C_pad > (nc - 1) * B_pad

        kern = functools.partial(
            _uce_kernel, s=self.s, m=self.m, l=self.l, bias=self._bias_val,
            tb=TB, tc=TC, n_batch=B, n_classes=C,
            mask_rows=(B_pad != B), mask_cols=(C_pad != C),
            class_outer=class_outer)

        if class_outer:
            grid = (nc, nb)
            x_map = lambda c, b: (b, 0)
            w_map = lambda c, b: (c, 0)
            lbl_map = lambda c, b: (b, 0)
            out_map = lambda c, b: (b, c)
        else:
            grid = (nb, nc)
            x_map = lambda b, c: (b, 0)
            w_map = lambda b, c: (c, 0)
            lbl_map = lambda b, c: (b, 0)
            out_map = lambda b, c: (b, c)

        call = pl.pallas_call(
            kern,
            out_shape=(jax.ShapeDtypeStruct((B_pad, C_pad), self.cos_dtype),
                       jax.ShapeDtypeStruct((nb, nc), jnp.float32)),
            grid=grid,
            in_specs=[
                pl.BlockSpec((TB, D), x_map),     # x (bf16)
                pl.BlockSpec((TC, D), w_map),     # normalized W (bf16)
                pl.BlockSpec((TB, 1), lbl_map),   # labels
            ],
            out_specs=(
                pl.BlockSpec((TB, TC), out_map),  # cos_theta (lane-dense)
                pl.BlockSpec((1, 1), out_map,
                             memory_space=pltpu.MemorySpace.SMEM),  # loss partials
            ),
            compiler_params=pltpu.CompilerParams(
                dimension_semantics=("parallel", "parallel"),
                vmem_limit_bytes=vmem))

        def fn(x, labels, wn):
            x_p = x.astype(jnp.bfloat16)
            lbl = labels.astype(jnp.int32).reshape(B, 1)
            if B_pad != B:
                x_p = jnp.pad(x_p, ((0, B_pad - B), (0, 0)))
                lbl = jnp.pad(lbl, ((0, B_pad - B), (0, 0)), constant_values=-1)
            cos_pad, partials = call(x_p, wn, lbl)
            loss = jnp.sum(partials) / jnp.float32(B)
            return cos_pad[:B, :C], loss
        return jax.jit(fn)

    def __call__(self, x, label=None):
        B, D = x.shape
        assert D == self.in_features
        wn = self._normalized_weight()

        key = (int(B), label is None)
        if key not in self._fn_cache:
            self._fn_cache[key] = self._build_fn(B, with_label=(label is not None))
        fn = self._fn_cache[key]

        if label is None:
            return (fn(x, wn),)
        cos, loss = fn(x, jnp.asarray(label), wn)
        return cos, loss


# -----------------------------------------------------------------------------
# Pure-JAX reference matching the PyTorch module (matmul precision selectable).
# -----------------------------------------------------------------------------
def _reference_forward(x, weight, bias, s, m, l, label=None,
                       matmul_dtype=jnp.float32):
    sumsq = jnp.sum(weight * weight, axis=1, keepdims=True)
    w_n = weight * lax.rsqrt(jnp.maximum(sumsq, 1e-10))
    cos = jnp.dot(x.astype(matmul_dtype), w_n.astype(matmul_dtype).T,
                  preferred_element_type=jnp.float32)
    if label is None:
        return (cos,)
    cmp_p = s * (cos - m) - bias[0]
    cmp_n = s * cos - bias[0]
    p_loss = jnp.log(1.0 + jnp.exp(-jnp.clip(cmp_p, -s, s)))
    n_loss = jnp.log(1.0 + jnp.exp(jnp.clip(cmp_n, -s, s))) * l
    one_hot = jax.nn.one_hot(label, cos.shape[1], dtype=jnp.bool_)
    loss = jnp.where(one_hot, p_loss, n_loss).sum(axis=1).mean()
    return cos, loss


if __name__ == "__main__":
    in_features = 32
    out_features = 16
    batch = 8

    key = jax.random.PRNGKey(0)
    k_w, k_x, k_lbl = jax.random.split(key, 3)

    module = UnifiedCrossEntropyLossPallas(in_features, out_features,
                                           m=0.4, s=64, l=1.0, r=1.0, key=k_w)

    x = jax.random.normal(k_x, (batch, in_features), dtype=jnp.float32)
    label = jax.random.randint(k_lbl, (batch,), 0, out_features, dtype=jnp.int32)

    # Training path: (cos_theta, loss)
    cos, loss = module(x, label)
    jax.block_until_ready((cos, loss))

    # Inference path: (cos_theta,) — loss math skipped entirely.
    (cos_only,) = module(x, None)
    jax.block_until_ready(cos_only)

    cos_f = cos.astype(jnp.float32)
    cos_only_f = cos_only.astype(jnp.float32)

    # Reference with matching bf16 MXU precision (tight check) ...
    ref_cos_bf16, ref_loss_bf16 = _reference_forward(
        x, module.weight, module.bias, module.s, module.m, module.l, label,
        matmul_dtype=jnp.bfloat16)
    # ... and full-f32 reference (PyTorch semantics; looser, bounds bf16 error).
    ref_cos_f32, ref_loss_f32 = _reference_forward(
        x, module.weight, module.bias, module.s, module.m, module.l, label,
        matmul_dtype=jnp.float32)

    assert cos.shape == (batch, out_features)
    assert jnp.allclose(cos_f, ref_cos_bf16, atol=2e-2, rtol=1e-2), "cos mismatch (bf16 ref)"
    assert jnp.allclose(loss, ref_loss_bf16, atol=0.5, rtol=2e-2), "loss mismatch (bf16 ref)"
    assert jnp.allclose(cos_only_f, cos_f, atol=1e-2), "cos-only path mismatch"
    assert jnp.allclose(cos_f, ref_cos_f32, atol=1e-1, rtol=5e-2), "cos mismatch (f32 ref)"
    assert jnp.allclose(loss, ref_loss_f32, atol=2.0, rtol=5e-2), "loss mismatch (f32 ref)"

    print("KERNEL_OK")
</pallas_src>

<mosaic_0001>
module attributes {stable_mosaic.version = 11 : i64} {
  func.func @_normalize_weight_kernel(%arg0: i32, %arg1: memref<128x32xf32, #tpu.memory_space<vmem>>, %arg2: memref<128x32xbf16, #tpu.memory_space<vmem>>) attributes {dimension_semantics = [#tpu.dimension_semantics<parallel>], iteration_bounds = array<i64: 1>, scalar_prefetch = 0 : i64, scratch_operands = 0 : i64, tpu.core_type = #tpu.core_type<tc>, window_params = [{transform_indices = @transform_0, window_bounds = array<i64: 128, 32>}, {transform_indices = @transform_1, window_bounds = array<i64: 128, 32>}]} {
    %c0 = arith.constant 0 : index
    %c0_0 = arith.constant 0 : index
    %0 = vector.load %arg1[%c0, %c0_0] : memref<128x32xf32, #tpu.memory_space<vmem>>, vector<128x32xf32>
    %1 = arith.mulf %0, %0 : vector<128x32xf32>
    %cst = arith.constant dense<0.000000e+00> : vector<128xf32>
    %2 = vector.multi_reduction <add>, %1, %cst [1] : vector<128x32xf32> to vector<128xf32>
    %3 = vector.shape_cast %2 : vector<128xf32> to vector<128x1xf32>
    %cst_1 = arith.constant 1.000000e-10 : f32
    %4 = vector.broadcast %cst_1 : f32 to vector<128x1xf32>
    %5 = arith.maximumf %3, %4 : vector<128x1xf32>
    %6 = math.rsqrt %5 : vector<128x1xf32>
    %7 = vector.broadcast %6 : vector<128x1xf32> to vector<128x32xf32>
    %8 = arith.mulf %0, %7 : vector<128x32xf32>
    %9 = arith.truncf %8 : vector<128x32xf32> to vector<128x32xbf16>
    %c0_2 = arith.constant 0 : index
    %c0_3 = arith.constant 0 : index
    %10 = vector.load %arg2[%c0_2, %c0_3] : memref<128x32xbf16, #tpu.memory_space<vmem>>, vector<128x32xbf16>
    tpu.vector_store %arg2[%c0_2, %c0_3], %9 {strides = array<i32>} : memref<128x32xbf16, #tpu.memory_space<vmem>>, vector<128x32xbf16>,
    return
  }
  func.func @transform_0(%arg0: i32) -> (i32, i32) {
    %c0_i32 = arith.constant 0 : i32
    %c0_i32_0 = arith.constant 0 : i32
    return %arg0, %c0_i32 : i32, i32
  }
  func.func @transform_1(%arg0: i32) -> (i32, i32) {
    %c0_i32 = arith.constant 0 : i32
    %c0_i32_0 = arith.constant 0 : i32
    return %arg0, %c0_i32 : i32, i32
  }
}

</mosaic_0001>

<bundles_post_ra>
// kernel: tpu_custom_call.1
= control target key start
LH: loop header
LB: loop body
LE: loop exit
PB: predicated region body
PF: predicated region fallthrough
CT: control target
= control target key end

     0   :  { %vm40_vm0 = vcmask 261120   ;;  %vm201_vm1 = vcmask 257024   ;;  %s504_s0 = inlined_call_operand.vmem [shape: f32[128,32], index: 0, kind: input, shape index: {}]   ;;  %s505_s1 = inlined_call_operand.vmem [shape: bf16[128,32], index: 1, kind: output, shape index: {}]  }
   0x1   :  { %v299_v0 = vld [vmem:[%s504_s0 + $0x10] sm:$0xff]  ;;  %v304_v1 = vld [vmem:[%s504_s0] sm:$0xff]  ;;  %v309_v2 = vld [vmem:[%s504_s0 + $0x18] sm:$0xff] }
   0x2   :  { %v26_v3 = vmul.f32 %v299_v0, %v299_v0  ;;  %v24_v4 = vmul.f32 %v304_v1, %v304_v1  ;;  %v27_v5 = vmul.f32 %v309_v2, %v309_v2  ;;  %v320_v6 = vld [vmem:[%s504_s0 + $0x8] sm:$0xff]  ;;  %v332_v9 = vld [vmem:[%s504_s0 + $0x20] sm:$0xff]  ;;  %v345_v16 = vld [vmem:[%s504_s0 + $0x38] sm:$0xff] }
   0x3   :  { %v25_v7 = vmul.f32 %v320_v6, %v320_v6  ;;  %v327_v8 = vld [vmem:[%s504_s0 + $0x28] sm:$0xff]  ;;  %v28_v15 = vmul.f32 %v332_v9, %v332_v9  ;;  %v350_v17 = vld [vmem:[%s504_s0 + $0x30] sm:$0xff]  ;;  %v31_v20 = vmul.f32 %v345_v16, %v345_v16  ;;  %v366_v23 = vld [vmem:[%s504_s0 + $0x40] sm:$0xff] }
   0x4   :  { %v47_v10 = vsel %vm40_vm0, %v26_v3, 0.0  ;;  %v41_v11 = vsel %vm40_vm0, %v24_v4, 0.0  ;;  %v50_v12 = vsel %vm40_vm0, %v27_v5, 0.0  ;;  %v29_v14 = vmul.f32 %v327_v8, %v327_v8  ;;  %v361_v22 = vld [vmem:[%s504_s0 + $0x48] sm:$0xff]  ;;  %v377_v28 = vld [vmem:[%s504_s0 + $0x58] sm:$0xff]  ;;  %v382_v29 = vld [vmem:[%s504_s0 + $0x50] sm:$0xff] }
   0x5   :  { %48 = vadd.xlane.f32.xlu1 %v47_v10  ;;  %42 = vadd.xlane.f32.xlu0 %v41_v11  ;;  %v44_v13 = vsel %vm40_vm0, %v25_v7, 0.0  ;;  %v53_v19 = vsel %vm40_vm0, %v28_v15, 0.0  ;;  %v30_v21 = vmul.f32 %v350_v17, %v350_v17  ;;  %v62_v24 = vsel %vm40_vm0, %v31_v20, 0.0  ;;  %v393_v34 = vld [vmem:[%s504_s0 + $0x68] sm:$0xff]  ;;  %v398_v35 = vld [vmem:[%s504_s0 + $0x60] sm:$0xff]  ;;  %v409_v40 = vld [vmem:[%s504_s0 + $0x78] sm:$0xff] }
   0x6   :  { %v56_v18 = vsel %vm40_vm0, %v29_v14, 0.0  ;;  %v33_v26 = vmul.f32 %v361_v22, %v361_v22  ;;  %v32_v27 = vmul.f32 %v366_v23, %v366_v23  ;;  %v35_v32 = vmul.f32 %v377_v28, %v377_v28  ;;  %v414_v41 = vld [vmem:[%s504_s0 + $0x70] sm:$0xff] }
   0x7   :  { %v59_v25 = vsel %vm40_vm0, %v30_v21, 0.0  ;;  %v34_v33 = vmul.f32 %v382_v29, %v382_v29  ;;  %v37_v38 = vmul.f32 %v393_v34, %v393_v34  ;;  %v36_v39 = vmul.f32 %v398_v35, %v398_v35 }
   0x8   :  { %v68_v30 = vsel %vm40_vm0, %v33_v26, 0.0  ;;  %v65_v31 = vsel %vm40_vm0, %v32_v27, 0.0  ;;  %v74_v36 = vsel %vm40_vm0, %v35_v32, 0.0  ;;  %v39_v44 = vmul.f32 %v409_v40, %v409_v40 }
   0x9   :  { %51 = vadd.xlane.f32.xlu1 %v50_v12  ;;  %45 = vadd.xlane.f32.xlu0 %v44_v13  ;;  %v71_v37 = vsel %vm40_vm0, %v34_v33, 0.0  ;;  %v80_v42 = vsel %vm40_vm0, %v37_v38, 0.0  ;;  %v77_v43 = vsel %vm40_vm0, %v36_v39, 0.0  ;;  %v38_v45 = vmul.f32 %v414_v41, %v414_v41 }
   0xa   :  { %v86_v46 = vsel %vm40_vm0, %v39_v44, 0.0 }
   0xb   :  { %v83_v47 = vsel %vm40_vm0, %v38_v45, 0.0 }
   0xd   :  { %57 = vadd.xlane.f32.xlu1 %v56_v18  ;;  %54 = vadd.xlane.f32.xlu0 %v53_v19 }
  0x11   :  { %63 = vadd.xlane.f32.xlu1 %v62_v24  ;;  %60 = vadd.xlane.f32.xlu0 %v59_v25 }
  0x15   :  { %69 = vadd.xlane.f32.xlu1 %v68_v30  ;;  %66 = vadd.xlane.f32.xlu0 %v65_v31 }
  0x19   :  { %75 = vadd.xlane.f32.xlu1 %v74_v36  ;;  %72 = vadd.xlane.f32.xlu0 %v71_v37 }
  0x1d   :  { %81 = vadd.xlane.f32.xlu1 %v80_v42  ;;  %78 = vadd.xlane.f32.xlu0 %v77_v43 }
  0x21   :  { %87 = vadd.xlane.f32.xlu1 %v86_v46  ;;  %84 = vadd.xlane.f32.xlu0 %v83_v47 }
  0x92   :  { %v49_v48 = vpop.xlane.xlu1 %48  ;;  %v43_v49 = vpop.xlane.xlu0 %42 }
  0x93   :  { %v91_v50 = vmax.f32 %v49_v48, 1e-10  ;;  %v89_v51 = vmax.f32 %v43_v49, 1e-10 }
  0x95   :  { %254 = vrsqrt.f32 %v91_v50 }
  0x96   :  { %256 = vrsqrt.f32 %v89_v51  ;;  %v52_v52 = vpop.xlane.xlu1 %51  ;;  %v46_v53 = vpop.xlane.xlu0 %45 }
  0x97   :  { %v92_v54 = vmax.f32 %v52_v52, 1e-10  ;;  %v90_v55 = vmax.f32 %v46_v53, 1e-10 }
  0x99   :  { %258 = vrsqrt.f32 %v92_v54 }
  0x9a   :  { %260 = vrsqrt.f32 %v90_v55  ;;  %v58_v56 = vpop.xlane.xlu1 %57  ;;  %v55_v57 = vpop.xlane.xlu0 %54 }
  0x9b   :  { %v94_v58 = vmax.f32 %v58_v56, 1e-10  ;;  %v93_v59 = vmax.f32 %v55_v57, 1e-10 }
  0x9d   :  { %262 = vrsqrt.f32 %v94_v58 }
  0x9e   :  { %264 = vrsqrt.f32 %v93_v59  ;;  %v64_v60 = vpop.xlane.xlu1 %63  ;;  %v61_v61 = vpop.xlane.xlu0 %60 }
  0x9f   :  { %v255_v62 = vpop.eup %254  ;;  %v96_v63 = vmax.f32 %v64_v60, 1e-10  ;;  %v95_v3 = vmax.f32 %v61_v61, 1e-10 }
  0xa0   :  { %v257_v4 = vpop.eup %256  ;;  %v123_v5 = vmul.f32 %v255_v62, %v299_v0 }
  0xa1   :  { %v121_v7 = vmul.f32 %v257_v4, %v304_v1  ;;  %266 = vrsqrt.f32 %v96_v63 }
  0xa2   :  { %v240_v10 = vpack.c.bf16 %v123_v5, %v123_v5  ;;  %268 = vrsqrt.f32 %v95_v3  ;;  %v70_v11 = vpop.xlane.xlu1 %69  ;;  %v67_v12 = vpop.xlane.xlu0 %66 }
  0xa3   :  { %v259_v13 = vpop.eup %258  ;;  %v238_v14 = vpack.c.bf16 %v121_v7, %v121_v7  ;;  %v98_v15 = vmax.f32 %v70_v11, 1e-10  ;;  %v97_v18 = vmax.f32 %v67_v12, 1e-10 }
  0xa4   :  { %v261_v19 = vpop.eup %260  ;;  %204 = vst.msk [vmem:[%s505_s1 + $0x8] sm:$0xf] %vm201_vm1, %v240_v10  ;;  %v124_v0 = vmul.f32 %v259_v13, %v309_v2 }
  0xa5   :  { %202 = vst.msk [vmem:[%s505_s1] sm:$0xf] %vm201_vm1, %v238_v14  ;;  %v122_v1 = vmul.f32 %v261_v19, %v320_v6  ;;  %270 = vrsqrt.f32 %v98_v15 }
  0xa6   :  { %v241_v20 = vpack.c.bf16 %v124_v0, %v124_v0  ;;  %272 = vrsqrt.f32 %v97_v18  ;;  %v76_v21 = vpop.xlane.xlu1 %75  ;;  %v73_v24 = vpop.xlane.xlu0 %72 }
  0xa7   :  { %v263_v25 = vpop.eup %262  ;;  %v239_v26 = vpack.c.bf16 %v122_v1, %v122_v1  ;;  %v100_v27 = vmax.f32 %v76_v21, 1e-10  ;;  %v99_v30 = vmax.f32 %v73_v24, 1e-10 }
  0xa8   :  { %v265_v31 = vpop.eup %264  ;;  %205 = vst.msk [vmem:[%s505_s1 + $0xc] sm:$0xf] %vm201_vm1, %v241_v20  ;;  %v126_v2 = vmul.f32 %v263_v25, %v327_v8 }
  0xa9   :  { %203 = vst.msk [vmem:[%s505_s1 + $0x4] sm:$0xf] %vm201_vm1, %v239_v26  ;;  %v125_v6 = vmul.f32 %v265_v31, %v332_v9  ;;  %274 = vrsqrt.f32 %v100_v27 }
  0xaa   :  { %v243_v32 = vpack.c.bf16 %v126_v2, %v126_v2  ;;  %276 = vrsqrt.f32 %v99_v30  ;;  %v82_v33 = vpop.xlane.xlu1 %81  ;;  %v79_v36 = vpop.xlane.xlu0 %78 }
  0xab   :  { %v267_v37 = vpop.eup %266  ;;  %v242_v38 = vpack.c.bf16 %v125_v6, %v125_v6  ;;  %v102_v39 = vmax.f32 %v82_v33, 1e-10  ;;  %v101_v42 = vmax.f32 %v79_v36, 1e-10 }
  0xac   :  { %v269_v43 = vpop.eup %268  ;;  %207 = vst.msk [vmem:[%s505_s1 + $0x14] sm:$0xf] %vm201_vm1, %v243_v32  ;;  %v128_v8 = vmul.f32 %v267_v37, %v345_v16 }
  0xad   :  { %206 = vst.msk [vmem:[%s505_s1 + $0x10] sm:$0xf] %vm201_vm1, %v242_v38  ;;  %v127_v9 = vmul.f32 %v269_v43, %v350_v17  ;;  %278 = vrsqrt.f32 %v102_v39 }
  0xae   :  { %v245_v44 = vpack.c.bf16 %v128_v8, %v128_v8  ;;  %280 = vrsqrt.f32 %v101_v42  ;;  %v88_v45 = vpop.xlane.xlu1 %87  ;;  %v85_v46 = vpop.xlane.xlu0 %84 }
  0xaf   :  { %v271_v47 = vpop.eup %270  ;;  %v244_v48 = vpack.c.bf16 %v127_v9, %v127_v9  ;;  %v104_v49 = vmax.f32 %v88_v45, 1e-10  ;;  %v103_v50 = vmax.f32 %v85_v46, 1e-10 }
  0xb0   :  { %v273_v51 = vpop.eup %272  ;;  %209 = vst.msk [vmem:[%s505_s1 + $0x1c] sm:$0xf] %vm201_vm1, %v245_v44  ;;  %v130_v16 = vmul.f32 %v271_v47, %v361_v22 }
  0xb1   :  { %208 = vst.msk [vmem:[%s505_s1 + $0x18] sm:$0xf] %vm201_vm1, %v244_v48  ;;  %v129_v17 = vmul.f32 %v273_v51, %v366_v23  ;;  %282 = vrsqrt.f32 %v104_v49 }
  0xb2   :  { %v247_v52 = vpack.c.bf16 %v130_v16, %v130_v16  ;;  %284 = vrsqrt.f32 %v103_v50 }
  0xb3   :  { %v275_v53 = vpop.eup %274  ;;  %v246_v54 = vpack.c.bf16 %v129_v17, %v129_v17 }
  0xb4   :  { %v277_v55 = vpop.eup %276  ;;  %211 = vst.msk [vmem:[%s505_s1 + $0x24] sm:$0xf] %vm201_vm1, %v247_v52  ;;  %v132_v22 = vmul.f32 %v275_v53, %v377_v28 }
  0xb5   :  { %210 = vst.msk [vmem:[%s505_s1 + $0x20] sm:$0xf] %vm201_vm1, %v246_v54  ;;  %v131_v23 = vmul.f32 %v277_v55, %v382_v29 }
  0xb6   :  { %v249_v56 = vpack.c.bf16 %v132_v22, %v132_v22 }
  0xb7   :  { %v279_v57 = vpop.eup %278  ;;  %v248_v58 = vpack.c.bf16 %v131_v23, %v131_v23 }
  0xb8   :  { %v281_v59 = vpop.eup %280  ;;  %213 = vst.msk [vmem:[%s505_s1 + $0x2c] sm:$0xf] %vm201_vm1, %v249_v56  ;;  %v134_v60 = vmul.f32 %v279_v57, %v393_v34 }
  0xb9   :  { %212 = vst.msk [vmem:[%s505_s1 + $0x28] sm:$0xf] %vm201_vm1, %v248_v58  ;;  %v133_v28 = vmul.f32 %v281_v59, %v398_v35 }
  0xba   :  { %v251_v61 = vpack.c.bf16 %v134_v60, %v134_v60 }
  0xbb   :  { %v283_v29 = vpop.eup %282  ;;  %v250_v62 = vpack.c.bf16 %v133_v28, %v133_v28 }
  0xbc   :  { %v285_v63 = vpop.eup %284  ;;  %215 = vst.msk [vmem:[%s505_s1 + $0x34] sm:$0xf] %vm201_vm1, %v251_v61  ;;  %v136_v3 = vmul.f32 %v283_v29, %v409_v40 }
  0xbd   :  { %214 = vst.msk [vmem:[%s505_s1 + $0x30] sm:$0xf] %vm201_vm1, %v250_v62  ;;  %v135_v34 = vmul.f32 %v285_v63, %v414_v41 }
  0xbe   :  { %v253_v4 = vpack.c.bf16 %v136_v3, %v136_v3 }
  0xbf   :  { %v252_v35 = vpack.c.bf16 %v135_v34, %v135_v34 }
  0xc0   :  { %217 = vst.msk [vmem:[%s505_s1 + $0x3c] sm:$0xf] %vm201_vm1, %v253_v4 }
  0xc1   :  { %216 = vst.msk [vmem:[%s505_s1 + $0x38] sm:$0xf] %vm201_vm1, %v252_v35 }

</bundles_post_ra>
